<compile_context>
chip_gen: v6e
topology: v6e:2x2x1
jax: 0.10.0
libtpu: 0.0.40
codegen_flags: <defaults>
</compile_context>

<pallas_src>
import functools

import jax
import jax.numpy as jnp
from jax.experimental import pallas as pl
from jax.experimental.pallas import tpu as pltpu


def _round_up(x: int, m: int) -> int:
    return ((x + m - 1) // m) * m


def _sublane_multiple(dtype) -> int:
    return {4: 8, 2: 16, 1: 32}.get(jnp.dtype(dtype).itemsize, 8)


def _choose_tb(B: int, block_b: int, multiple: int) -> int:
    """Adaptive batch tile (trace-time): single tile if the batch fits, else
    the largest multiple-of-`multiple` tile <= block_b with small padding
    waste, falling back to the minimum-waste candidate."""
    B_min = _round_up(B, multiple)
    if B_min <= block_b:
        return B_min  # one tile covers the whole batch
    max_tb = max((block_b // multiple) * multiple, multiple)
    best_tb = max_tb
    best_waste = _round_up(B, max_tb) - B
    for tb in range(max_tb, multiple - 1, -multiple):
        waste = _round_up(B, tb) - B
        if waste * 16 <= B:  # <= ~6% padded rows: take the largest such tile
            return tb
        if waste < best_waste:
            best_tb, best_waste = tb, waste
    return best_tb


def decoder_kernel(x_ref, w1_ref, b1_ref, w2_ref, b2_ref, o_ref):
    # fc1 (MXU, f32 accumulate)
    h = jnp.dot(x_ref[...], w1_ref[...], preferred_element_type=jnp.float32)
    # bias + relu epilogue in f32 (VPU) -- keeps v5e happy (no bf16 VPU there).
    h = jnp.maximum(h + b1_ref[...].astype(jnp.float32), 0.0)
    # dropout (eval mode) == identity
    # fc2: cast hidden to the weight dtype so both MXU operands match.
    h = h.astype(w2_ref.dtype)
    y = jnp.dot(h, w2_ref[...], preferred_element_type=jnp.float32)
    y = y + b2_ref[...].astype(jnp.float32)
    o_ref[...] = y.astype(o_ref.dtype)


def prepare_params(w1, b1, w2, b2):
    """One-time (outside the jitted forward) padding of the VMEM-resident
    weights: only the hidden dim is padded to a multiple of 128.  Zero padding
    is semantics-preserving (relu(0 + 0) = 0 feeds zero rows of w2)."""
    HID = w1.shape[1]
    HID_p = _round_up(HID, 128)
    w1p = jnp.pad(w1, ((0, 0), (0, HID_p - HID)))
    b1p = jnp.pad(b1, ((0, 0), (0, HID_p - HID)))
    w2p = jnp.pad(w2, ((0, HID_p - HID), (0, 0)))
    return w1p, b1p, w2p, b2


@functools.partial(jax.jit, static_argnames=("block_b",))
def decoder_forward(x, w1p, b1p, w2p, b2, *, block_b: int = 1024):
    """x: [B, input_size]; pre-padded params from prepare_params():
       w1p: [input_size, HID_p]; b1p: [1, HID_p]; w2p: [HID_p, output]; b2: [1, output]
       -> [B, output]

    Weights are stored pre-transposed ([in, out]) relative to PyTorch so the
    kernel runs plain row-major matmuls on the MXU.
    """
    B, IN = x.shape
    HID_p = w1p.shape[1]
    OUT = w2p.shape[1]

    multiple = _sublane_multiple(x.dtype)
    TB = _choose_tb(B, block_b, multiple)
    B_p = _round_up(B, TB)

    xp = x if B_p == B else jnp.pad(x, ((0, B_p - B), (0, 0)))

    grid = (B_p // TB,)

    itemsize = jnp.dtype(x.dtype).itemsize
    w_itemsize = jnp.dtype(w1p.dtype).itemsize
    flops = 2 * B_p * (IN * HID_p + HID_p * OUT)
    bytes_accessed = (
        B_p * IN * itemsize            # x in
        + B_p * OUT * itemsize         # out
        + (IN * HID_p + HID_p * OUT + HID_p + OUT) * w_itemsize  # weights/biases
    )

    out = pl.pallas_call(
        decoder_kernel,
        out_shape=jax.ShapeDtypeStruct((B_p, OUT), x.dtype),
        grid=grid,
        in_specs=[
            pl.BlockSpec((TB, IN), lambda i: (i, 0)),       # x: streams over batch, native width
            pl.BlockSpec((IN, HID_p), lambda i: (0, 0)),    # w1: VMEM-resident
            pl.BlockSpec((1, HID_p), lambda i: (0, 0)),     # b1: VMEM-resident
            pl.BlockSpec((HID_p, OUT), lambda i: (0, 0)),   # w2: VMEM-resident
            pl.BlockSpec((1, OUT), lambda i: (0, 0)),       # b2: VMEM-resident
        ],
        out_specs=pl.BlockSpec((TB, OUT), lambda i: (i, 0)),
        compiler_params=pltpu.CompilerParams(
            dimension_semantics=("parallel",),
        ),
        cost_estimate=pl.CostEstimate(
            flops=flops, transcendentals=0, bytes_accessed=bytes_accessed),
    )(xp, w1p, b1p, w2p, b2)

    # Only padded batch rows (bias garbage) are sliced off; no lane slice.
    return out if B_p == B else out[:B]


def init_params(key, input_size, hidden_size, output_size, dtype=jnp.float32):
    """Deterministic init mimicking nn.Linear's uniform(-1/sqrt(fan_in), 1/sqrt(fan_in))."""
    k1, k2, k3, k4 = jax.random.split(key, 4)
    bound1 = 1.0 / (input_size ** 0.5)
    bound2 = 1.0 / (hidden_size ** 0.5)
    # stored as [in, out] (transpose of PyTorch's [out, in])
    w1 = jax.random.uniform(k1, (input_size, hidden_size), jnp.float32, -bound1, bound1)
    b1 = jax.random.uniform(k2, (1, hidden_size), jnp.float32, -bound1, bound1)
    w2 = jax.random.uniform(k3, (hidden_size, output_size), jnp.float32, -bound2, bound2)
    b2 = jax.random.uniform(k4, (1, output_size), jnp.float32, -bound2, bound2)
    return tuple(p.astype(dtype) for p in (w1, b1, w2, b2))


def reference_forward(x, w1, b1, w2, b2):
    x, w1, b1, w2, b2 = (a.astype(jnp.float32) for a in (x, w1, b1, w2, b2))
    h = jnp.maximum(x @ w1 + b1, 0.0)
    return h @ w2 + b2


if __name__ == "__main__":
    # Small shapes consistent with the module: batch=8, input=32, hidden=64, output=32
    B, IN, HID, OUT = 8, 32, 64, 32
    key = jax.random.PRNGKey(0)
    kx, kb, kp = jax.random.split(key, 3)

    # --- f32 path: exact-ish check ---
    x = jax.random.normal(kx, (B, IN), jnp.float32)
    w1, b1, w2, b2 = init_params(kp, IN, HID, OUT, dtype=jnp.float32)
    params = prepare_params(w1, b1, w2, b2)   # one-time weight padding, outside the jit
    out = jax.block_until_ready(decoder_forward(x, *params))
    ref = reference_forward(x, w1, b1, w2, b2)
    assert out.shape == (B, OUT)
    assert jnp.allclose(out, ref, atol=1e-5, rtol=1e-5), "f32 mismatch vs reference"

    # --- odd batch (exercises batch padding + slice path) ---
    x_odd = x[:5]
    out_odd = jax.block_until_ready(decoder_forward(x_odd, *params))
    assert out_odd.shape == (5, OUT)
    assert jnp.allclose(out_odd, ref[:5], atol=1e-5, rtol=1e-5), "odd-batch mismatch"

    # --- bigger batch with a small block_b: exercises multi-tile grid + adaptive TB ---
    x_big = jax.random.normal(kb, (200, IN), jnp.float32)
    out_big = jax.block_until_ready(decoder_forward(x_big, *params, block_b=64))
    ref_big = reference_forward(x_big, w1, b1, w2, b2)
    assert out_big.shape == (200, OUT)
    assert jnp.allclose(out_big, ref_big, atol=1e-5, rtol=1e-5), "multi-tile mismatch"

    # --- bf16 operands (MXU fast path on v6e/v7x), f32 accumulate ---
    x_bf = x.astype(jnp.bfloat16)
    params_bf = prepare_params(*(p.astype(jnp.bfloat16) for p in (w1, b1, w2, b2)))
    out_bf = jax.block_until_ready(decoder_forward(x_bf, *params_bf))
    ref_bf = reference_forward(x_bf, w1.astype(jnp.bfloat16), b1.astype(jnp.bfloat16),
                               w2.astype(jnp.bfloat16), b2.astype(jnp.bfloat16))
    assert out_bf.shape == (B, OUT)
    assert jnp.allclose(out_bf.astype(jnp.float32), ref_bf, atol=1e-1, rtol=1e-1), \
        "bf16 mismatch vs reference"

    print("KERNEL_OK")
</pallas_src>

<mosaic_0001>
module attributes {stable_mosaic.version = 11 : i64} {
  func.func @decoder_kernel(%arg0: i32, %arg1: memref<8x32xf32, #tpu.memory_space<vmem>>, %arg2: memref<32x128xf32, #tpu.memory_space<vmem>>, %arg3: memref<1x128xf32, #tpu.memory_space<vmem>>, %arg4: memref<128x32xf32, #tpu.memory_space<vmem>>, %arg5: memref<1x32xf32, #tpu.memory_space<vmem>>, %arg6: memref<8x32xf32, #tpu.memory_space<vmem>>) attributes {dimension_semantics = [#tpu.dimension_semantics<parallel>], iteration_bounds = array<i64: 1>, scalar_prefetch = 0 : i64, scratch_operands = 0 : i64, tpu.core_type = #tpu.core_type<tc>, window_params = [{transform_indices = @transform_0, window_bounds = array<i64: 8, 32>}, {pipeline_mode = #tpu.pipeline_mode<synchronous>, transform_indices = @transform_1, window_bounds = array<i64: 32, 128>}, {pipeline_mode = #tpu.pipeline_mode<synchronous>, transform_indices = @transform_2, window_bounds = array<i64: 1, 128>}, {pipeline_mode = #tpu.pipeline_mode<synchronous>, transform_indices = @transform_3, window_bounds = array<i64: 128, 32>}, {pipeline_mode = #tpu.pipeline_mode<synchronous>, transform_indices = @transform_4, window_bounds = array<i64: 1, 32>}, {transform_indices = @transform_5, window_bounds = array<i64: 8, 32>}]} {
    %c0 = arith.constant 0 : index
    %c0_0 = arith.constant 0 : index
    %0 = vector.load %arg1[%c0, %c0_0] : memref<8x32xf32, #tpu.memory_space<vmem>>, vector<8x32xf32>
    %c0_1 = arith.constant 0 : index
    %c0_2 = arith.constant 0 : index
    %1 = vector.load %arg2[%c0_1, %c0_2] : memref<32x128xf32, #tpu.memory_space<vmem>>, vector<32x128xf32>
    %cst = arith.constant dense<0.000000e+00> : vector<8x128xf32>
    %2 = tpu.matmul %0, %1, %cst {dimension_numbers = #tpu.dot_dimension_numbers<[1], [0], [0], [1], [0, 0, 1, 1], [], []>} : vector<8x32xf32>, vector<32x128xf32>, vector<8x128xf32> -> vector<8x128xf32>
    %c0_3 = arith.constant 0 : index
    %c0_4 = arith.constant 0 : index
    %3 = vector.load %arg3[%c0_3, %c0_4] : memref<1x128xf32, #tpu.memory_space<vmem>>, vector<1x128xf32>
    %4 = vector.broadcast %3 : vector<1x128xf32> to vector<8x128xf32>
    %5 = arith.addf %2, %4 : vector<8x128xf32>
    %cst_5 = arith.constant 0.000000e+00 : f32
    %6 = vector.broadcast %cst_5 : f32 to vector<8x128xf32>
    %7 = arith.maximumf %5, %6 : vector<8x128xf32>
    %c0_6 = arith.constant 0 : index
    %c0_7 = arith.constant 0 : index
    %8 = vector.load %arg4[%c0_6, %c0_7] : memref<128x32xf32, #tpu.memory_space<vmem>>, vector<128x32xf32>
    %cst_8 = arith.constant dense<0.000000e+00> : vector<8x32xf32>
    %9 = tpu.matmul %7, %8, %cst_8 {dimension_numbers = #tpu.dot_dimension_numbers<[1], [0], [0], [1], [0, 0, 1, 1], [], []>} : vector<8x128xf32>, vector<128x32xf32>, vector<8x32xf32> -> vector<8x32xf32>
    %c0_9 = arith.constant 0 : index
    %c0_10 = arith.constant 0 : index
    %10 = vector.load %arg5[%c0_9, %c0_10] : memref<1x32xf32, #tpu.memory_space<vmem>>, vector<1x32xf32>
    %11 = vector.broadcast %10 : vector<1x32xf32> to vector<8x32xf32>
    %12 = arith.addf %9, %11 : vector<8x32xf32>
    %c0_11 = arith.constant 0 : index
    %c0_12 = arith.constant 0 : index
    %13 = vector.load %arg6[%c0_11, %c0_12] : memref<8x32xf32, #tpu.memory_space<vmem>>, vector<8x32xf32>
    tpu.vector_store %arg6[%c0_11, %c0_12], %12 {strides = array<i32>} : memref<8x32xf32, #tpu.memory_space<vmem>>, vector<8x32xf32>,
    return
  }
  func.func @transform_0(%arg0: i32) -> (i32, i32) {
    %c0_i32 = arith.constant 0 : i32
    %c0_i32_0 = arith.constant 0 : i32
    return %arg0, %c0_i32 : i32, i32
  }
  func.func @transform_1(%arg0: i32) -> (i32, i32) {
    %c0_i32 = arith.constant 0 : i32
    %c0_i32_0 = arith.constant 0 : i32
    %c0_i32_1 = arith.constant 0 : i32
    return %c0_i32, %c0_i32_0 : i32, i32
  }
  func.func @transform_2(%arg0: i32) -> (i32, i32) {
    %c0_i32 = arith.constant 0 : i32
    %c0_i32_0 = arith.constant 0 : i32
    %c0_i32_1 = arith.constant 0 : i32
    return %c0_i32, %c0_i32_0 : i32, i32
  }
  func.func @transform_3(%arg0: i32) -> (i32, i32) {
    %c0_i32 = arith.constant 0 : i32
    %c0_i32_0 = arith.constant 0 : i32
    %c0_i32_1 = arith.constant 0 : i32
    return %c0_i32, %c0_i32_0 : i32, i32
  }
  func.func @transform_4(%arg0: i32) -> (i32, i32) {
    %c0_i32 = arith.constant 0 : i32
    %c0_i32_0 = arith.constant 0 : i32
    %c0_i32_1 = arith.constant 0 : i32
    return %c0_i32, %c0_i32_0 : i32, i32
  }
  func.func @transform_5(%arg0: i32) -> (i32, i32) {
    %c0_i32 = arith.constant 0 : i32
    %c0_i32_0 = arith.constant 0 : i32
    return %arg0, %c0_i32 : i32, i32
  }
}

</mosaic_0001>

<bundles_post_ra>
// kernel: decoder_forward.1
= control target key start
LH: loop header
LB: loop body
LE: loop exit
PB: predicated region body
PF: predicated region fallthrough
CT: control target
= control target key end

     0   :  { %v312_v1 = vmov 0.0   ;;  %vm313_vm0 = vmmov 0   ;;  %vm33_vm1 = vcmask 261120   ;;  %s443_s0 = inlined_call_operand.vmem [shape: f32[8,32], index: 0, kind: input, shape index: {}]   ;;  %s444_s1 = inlined_call_operand.vmem [shape: f32[32,128], index: 1, kind: input, shape index: {}]   ;;  %s445_s2 = inlined_call_operand.vmem [shape: f32[1,128], index: 2, kind: input, shape index: {}]   ;;  %s446_s3 = inlined_call_operand.vmem [shape: f32[128,32], index: 3, kind: input, shape index: {}]   ;;  %s447_s4 = inlined_call_operand.vmem [shape: f32[1,32], index: 4, kind: input, shape index: {}]   ;;  %s448_s5 = inlined_call_operand.hbm [shape: f32[8,32], index: 5, kind: output, shape index: {}]  }
   0x1   :  { %v25_v0 = vld [vmem:[%s444_s1 + $0x18] sm:$0xff]  ;;  %241 = vmatprep.subr.mxu0 %v312_v1  ;;  %v24_v2 = vld [vmem:[%s444_s1 + $0x10] sm:$0xff]  ;;  %249 = vmatprep.mubr.msk.f32.mxu0 %vm313_vm0, %v312_v1  ;;  %v23_v5 = vld [vmem:[%s444_s1 + $0x8] sm:$0xff] }
   0x2   :  { %v123_v3 = vld [vmem:[%s446_s3 + $0x78] sm:$0xff]  ;;  %242 = vmatpush3.msra.mxu0 %v25_v0  ;;  %252 = vmatprep.subr.mxu1 %v312_v1  ;;  %v122_v4 = vld [vmem:[%s446_s3 + $0x70] sm:$0xff]  ;;  %v121_v6 = vld [vmem:[%s446_s3 + $0x68] sm:$0xff] }
   0x3   :  { %243 = vmatprep.subr.mxu0 %v312_v1  ;;  %253 = vmatpush3.msra.mxu1 %v123_v3  ;;  %v22_v7 = vld [vmem:[%s444_s1] sm:$0xff] }
   0x4   :  { %244 = vmatpush3.msra.mxu0 %v24_v2  ;;  %254 = vmatprep.subr.mxu1 %v312_v1  ;;  %v21_v8 = vld [vmem:[%s443_s0] sm:$0xff] }
   0x5   :  { %245 = vmatprep.subr.mxu0 %v312_v1  ;;  %255 = vmatpush3.msra.mxu1 %v122_v4  ;;  %v120_v9 = vld [vmem:[%s446_s3 + $0x60] sm:$0xff] }
   0x6   :  { %246 = vmatpush3.msra.mxu0 %v23_v5  ;;  %256 = vmatprep.subr.mxu1 %v312_v1 }
   0x7   :  { %10 = vsyncpa [#allocation3], 0  ;;  %247 = vmatprep.subr.mxu0 %v312_v1  ;;  %257 = vmatpush3.msra.mxu1 %v121_v6  ;;  %v119_v10 = vld [vmem:[%s446_s3 + $0x58] sm:$0xff]  ;;  %v118_v11 = vld [vmem:[%s446_s3 + $0x50] sm:$0xff]  ;;  %s314_s11 = smov [#allocation2]  }
   0x8   :  { %248 = vmatpush3.msra.mxu0 %v22_v7  ;;  %258 = vmatprep.subr.mxu1 %v312_v1  ;;  %v117_v12 = vld [vmem:[%s446_s3 + $0x48] sm:$0xff]  ;;  %v116_v13 = vld [vmem:[%s446_s3 + $0x40] sm:$0xff]  ;;  %v115_v14 = vld [vmem:[%s446_s3 + $0x38] sm:$0xff]  ;;  %s208_s0 = sshll.u32 %s314_s11, 4  ;;  %s209_s0 = int_to_ptr.vmem [resolvable:$true] %s208_s0 }
   0x9   :  { %250 = vmatmul.mubr.msk.f32.vlgmr.msra.gmra.mxu0 %vm33_vm1, %v21_v8  ;;  %259 = vmatpush3.msra.mxu1 %v120_v9  ;;  %v114_v15 = vld [vmem:[%s446_s3 + $0x30] sm:$0xff]  ;;  %v113_v16 = vld [vmem:[%s446_s3 + $0x28] sm:$0xff]  ;;  %v112_v17 = vld [vmem:[%s446_s3 + $0x20] sm:$0xff]  ;;  %p295_p1 = scmp.lt.s32.totalorder %s209_s0, %s209_s0 }
   0xa   :  { %260 = vmatprep.subr.mxu1 %v312_v1  ;;  %284 = vmatprep.mubr.msk.f32.mxu1 %vm313_vm0, %v312_v1  ;;  %v111_v18 = vld [vmem:[%s446_s3 + $0x18] sm:$0xff]  ;;  %v110_v19 = vld [vmem:[%s446_s3 + $0x10] sm:$0xff]  ;;  %v109_v20 = vld [vmem:[%s446_s3 + $0x8] sm:$0xff] }
   0xb   :  { %261 = vmatpush3.msra.mxu1 %v119_v10  ;;  %v108_v21 = vld [vmem:[%s446_s3] sm:$0xff]  ;;  %s290_s3 = scalar_lea.vmem %s209_s0, 128 }
   0xc   :  { %262 = vmatprep.subr.mxu1 %v312_v1  ;;  %v216_v22 = vld [vmem:[%s445_s2] ss:$0 sm:$0xff]  ;;  %p291_p0 = scmp.ne.s32.totalorder %s209_s0, %s290_s3  ;;  %p296_p2 = scmp.lt.s32.totalorder %s290_s3, %s290_s3 }
   0xd   :  { %263 = vmatpush3.msra.mxu1 %v118_v11  ;;  %v218_v27 = vld [vmem:[%s447_s4] ss:$0 sm:$0xff] }
   0xe   :  { %264 = vmatprep.subr.mxu1 %v312_v1  ;;  %p297_p3 = por %p296_p2, %p295_p1 }
   0xf   :  { %265 = vmatpush3.msra.mxu1 %v117_v12 }
  0x10   :  { %266 = vmatprep.subr.mxu1 %v312_v1  ;;  %p298_p4 = pnand %p297_p3, %p291_p0 }
  0x11   :  { %267 = vmatpush3.msra.mxu1 %v116_v13 }
  0x12   :  { %268 = vmatprep.subr.mxu1 %v312_v1 }
  0x13   :  { %269 = vmatpush3.msra.mxu1 %v115_v14 }
  0x14   :  { %270 = vmatprep.subr.mxu1 %v312_v1 }
  0x15   :  { %271 = vmatpush3.msra.mxu1 %v114_v15 }
  0x16   :  { %272 = vmatprep.subr.mxu1 %v312_v1 }
  0x17   :  { %273 = vmatpush3.msra.mxu1 %v113_v16 }
  0x18   :  { %274 = vmatprep.subr.mxu1 %v312_v1 }
  0x19   :  { %275 = vmatpush3.msra.mxu1 %v112_v17 }
  0x1a   :  { %276 = vmatprep.subr.mxu1 %v312_v1 }
  0x1b   :  { %277 = vmatpush3.msra.mxu1 %v111_v18 }
  0x1c   :  { %278 = vmatprep.subr.mxu1 %v312_v1 }
  0x1d   :  { %279 = vmatpush3.msra.mxu1 %v110_v19 }
  0x1e   :  { %280 = vmatprep.subr.mxu1 %v312_v1 }
  0x1f   :  { %281 = vmatpush3.msra.mxu1 %v109_v20 }
  0x20   :  { %282 = vmatprep.subr.mxu1 %v312_v1 }
  0x21   :  { %283 = vmatpush3.msra.mxu1 %v108_v21 }
  0xc9   :  { %v103_v23 = vpop.f32.mrf.mxu0 }
  0xca   :  { %v104_v24 = vadd.f32 %v216_v22, %v103_v23 }
  0xcb   :  { %v251_v25 = vpop.f32.mrf.mxu0 }
  0xcc   :  { %v107_v26 = vmax.f32 %v104_v24, 0.0 }
  0xce   :  { %285 = vmatmul.mubr.f32.vlgmr.msra.gmra.mxu1 %v107_v26 }
 0x18e   :  { %v197_v28 = vpop.f32.mrf.mxu1 }
 0x18f   :  { %v198_v29 = vadd.f32 %v218_v27, %v197_v28 }
 0x190   :  { %v286_v30 = vpop.f32.mrf.mxu1 }
 0x191   :  { %201 = vst.msk [vmem:[#allocation2] sm:$0xff] %vm33_vm1, %v198_v29 }
 0x192   :  { %301 = shalt.err (!%p298_p4)
}
 0x193   :  { %211 = dma.vmem_to_hbm [thread:$0]  %s209_s0, 128, %s448_s5, [#allocation3]  }
 0x194   :  { %310 = dma.done.wait [#allocation3], 128  }
 0x195   :  { %311 = vsyncadd [#allocation3], 4294967168 }
 0x196   :  { %215 = vsyncpa [#allocation3], 1 }

</bundles_post_ra>
